<compile_context>
chip_gen: v6e
topology: v6e:2x2x1
jax: 0.10.0
libtpu: 0.0.40
codegen_flags: <defaults>
</compile_context>

<pallas_src>
import math

import jax
import jax.numpy as jnp
from jax.experimental import pallas as pl
from jax.experimental.pallas import tpu as pltpu


_VMEM_BUDGET_BYTES = 36 * 1024 * 1024   # conservative: fits every generation
_VMEM_LIMIT_BYTES = 48 * 1024 * 1024    # scoped limit requested from Mosaic


def _round_up(x: int, m: int) -> int:
    return ((x + m - 1) // m) * m


def _make_kernel(num_inputs: int, inv_scale: float):
    """Kernel for `num_inputs` (x_i, R_i) pairs. Ref order: x_0..x_{n-1}, R_0..R_{n-1}, out."""

    def kernel(*refs):
        out_ref = refs[-1]
        x_refs = refs[:num_inputs]
        r_refs = refs[num_inputs:2 * num_inputs]

        # return_list[0] / N**(1/n): fold the divide into a single multiply.
        acc = jnp.dot(
            x_refs[0][...], r_refs[0][...],
            preferred_element_type=jnp.float32,
        ) * jnp.float32(inv_scale)

        # Elementwise product with the remaining random projections.
        for i in range(1, num_inputs):
            acc = acc * jnp.dot(
                x_refs[i][...], r_refs[i][...],
                preferred_element_type=jnp.float32,
            )

        out_ref[...] = acc.astype(out_ref.dtype)

    return kernel


def _est_vmem_bytes(tb, tn, ks, op_itemsize, out_itemsize):
    # Default pipeline depth is 2 buffers per operand and per output.
    x_bytes = 2 * sum(tb * k for k in ks) * op_itemsize
    r_bytes = 2 * sum(k * tn for k in ks) * op_itemsize
    o_bytes = 2 * tb * tn * out_itemsize
    return x_bytes + r_bytes + o_bytes


def random_layer_forward(input_list, random_matrices, *,
                         max_tb: int = 512, max_tn: int = 1024,
                         operand_dtype=None):
    """JAX/Pallas equivalent of RandomLayer.forward.

    input_list[i]:       [B, K_i]
    random_matrices[i]:  [K_i, N]
    returns:             [B, N]
    """
    assert len(input_list) == len(random_matrices) and len(input_list) >= 1
    n = len(input_list)
    B = input_list[0].shape[0]
    N = random_matrices[0].shape[1]
    ks = [r.shape[0] for r in random_matrices]
    out_dtype = input_list[0].dtype
    inv_scale = 1.0 / math.pow(float(N), 1.0 / n)

    xs = list(input_list)
    rs = list(random_matrices)
    if operand_dtype is not None:
        # Bandwidth option: cast operands (accumulation stays f32 in-kernel).
        xs = [x.astype(operand_dtype) for x in xs]
        rs = [r.astype(operand_dtype) for r in rs]
    op_itemsize = jnp.dtype(xs[0].dtype).itemsize
    out_itemsize = jnp.dtype(out_dtype).itemsize

    def est(tb, tn):
        return _est_vmem_bytes(tb, tn, ks, op_itemsize, out_itemsize)

    # ---- batch tile: multiple of 8, or the full dim (legal for any B). ----
    TB = min(max_tb, _round_up(B, 8))
    if TB >= B:
        TB = B

    # ---- output tile: Plan A (whole N -> R resident) unless VMEM-bound. ----
    TN = N
    if est(TB, TN) > _VMEM_BUDGET_BYTES and N > 128:
        # Plan B: tile the output dim (kept as the OUTER grid axis below so
        # each R tile is still fetched only once per output tile).
        TN = 128
        for cand in (1024, 512, 256, 128):
            if cand <= max_tn and cand <= N and est(TB, cand) <= _VMEM_BUDGET_BYTES:
                TN = cand
                break
    # Last resort: shrink the batch tile until the plan fits.
    while TB > 8 and est(TB, TN) > _VMEM_BUDGET_BYTES:
        TB = _round_up(max(8, TB // 2), 8)

    # ---- v7x megacore: a big-enough problem should have >= 2 grid steps. ----
    if pl.cdiv(B, TB) * pl.cdiv(N, TN) == 1 and B >= 16:
        TB = _round_up(pl.cdiv(B, 2), 8)

    nb = pl.cdiv(B, TB)
    nn = pl.cdiv(N, TN)

    if nn == 1:
        # Plan A: 1-D grid over batch; constant index_map for every R_i, so
        # each R_i is DMA'd exactly once and stays VMEM-resident.
        grid = (nb,)
        in_specs = (
            [pl.BlockSpec((TB, k), lambda b: (b, 0)) for k in ks]
            + [pl.BlockSpec((k, TN), lambda b: (0, 0)) for k in ks]
        )
        out_spec = pl.BlockSpec((TB, TN), lambda b: (b, 0))
        dim_sem = ("parallel",)
    else:
        # Plan B: output-dim OUTER, batch INNER -> the large R stream is
        # fetched once per output tile; only the tiny x stream repeats.
        grid = (nn, nb)
        in_specs = (
            [pl.BlockSpec((TB, k), lambda j, b: (b, 0)) for k in ks]
            + [pl.BlockSpec((k, TN), lambda j, b: (0, j)) for k in ks]
        )
        out_spec = pl.BlockSpec((TB, TN), lambda j, b: (b, j))
        dim_sem = ("parallel", "parallel")

    return pl.pallas_call(
        _make_kernel(n, inv_scale),
        out_shape=jax.ShapeDtypeStruct((B, N), out_dtype),
        grid=grid,
        in_specs=in_specs,
        out_specs=out_spec,
        compiler_params=pltpu.CompilerParams(
            dimension_semantics=dim_sem,
            vmem_limit_bytes=_VMEM_LIMIT_BYTES,
        ),
    )(*xs, *rs)


def _reference(input_list, random_matrices):
    """Pure-JAX reference mirroring the PyTorch module."""
    n = len(input_list)
    N = random_matrices[0].shape[1]
    return_list = [
        jnp.dot(x.astype(jnp.float32), r.astype(jnp.float32),
                precision=jax.lax.Precision.HIGHEST)
        for x, r in zip(input_list, random_matrices)
    ]
    out = return_list[0] / math.pow(float(N), 1.0 / n)
    for s in return_list[1:]:
        out = out * s
    return out


if __name__ == "__main__":
    key = jax.random.PRNGKey(0)
    keys = jax.random.split(key, 8)

    def _check(xs, rs, name):
        out = jax.block_until_ready(random_layer_forward(xs, rs))
        ref = _reference(xs, rs)
        assert out.shape == ref.shape, (name, out.shape, ref.shape)
        err = float(jnp.max(jnp.abs(out - ref)))
        assert jnp.allclose(out, ref, atol=1e-3, rtol=1e-3), (name, err)

    # Case 1: typical CDAN usage (feature x logits), aligned small shapes.
    B, dims, N = 8, (32, 16), 128
    xs = [jax.random.normal(keys[i], (B, d), jnp.float32) for i, d in enumerate(dims)]
    rs = [jax.random.normal(keys[2 + i], (d, N), jnp.float32) for i, d in enumerate(dims)]
    _check(xs, rs, "case1")

    # Case 2: unaligned K / N, single tile (block shapes == full dims; no pad).
    B2, dims2, N2 = 12, (20, 10), 96
    xs2 = [jax.random.normal(keys[4 + i], (B2, d), jnp.float32) for i, d in enumerate(dims2)]
    rs2 = [jax.random.normal(keys[6 + i], (d, N2), jnp.float32) for i, d in enumerate(dims2)]
    _check(xs2, rs2, "case2")

    # Case 3: batch split into 2 grid steps with a ragged last tile
    # (exercises the no-pad / no-slice boundary handling and the >=2-tile
    # megacore rule; the resident R blocks are fetched only once).
    B3, dims3, N3 = 20, (24, 8), 128
    xs3 = [jax.random.normal(keys[i], (B3, d), jnp.float32) for i, d in enumerate(dims3)]
    rs3 = [jax.random.normal(keys[2 + i], (d, N3), jnp.float32) for i, d in enumerate(dims3)]
    _check(xs3, rs3, "case3")

    print("KERNEL_OK")
</pallas_src>

<mosaic_0001>
module attributes {stable_mosaic.version = 11 : i64} {
  func.func @kernel(%arg0: i32, %arg1: memref<8x32xf32, #tpu.memory_space<vmem>>, %arg2: memref<8x16xf32, #tpu.memory_space<vmem>>, %arg3: memref<32x128xf32, #tpu.memory_space<vmem>>, %arg4: memref<16x128xf32, #tpu.memory_space<vmem>>, %arg5: memref<8x128xf32, #tpu.memory_space<vmem>>) attributes {dimension_semantics = [#tpu.dimension_semantics<parallel>], iteration_bounds = array<i64: 1>, scalar_prefetch = 0 : i64, scratch_operands = 0 : i64, tpu.core_type = #tpu.core_type<tc>, window_params = [{transform_indices = @transform_0, window_bounds = array<i64: 8, 32>}, {transform_indices = @transform_1, window_bounds = array<i64: 8, 16>}, {pipeline_mode = #tpu.pipeline_mode<synchronous>, transform_indices = @transform_2, window_bounds = array<i64: 32, 128>}, {pipeline_mode = #tpu.pipeline_mode<synchronous>, transform_indices = @transform_3, window_bounds = array<i64: 16, 128>}, {transform_indices = @transform_4, window_bounds = array<i64: 8, 128>}]} {
    %c0 = arith.constant 0 : index
    %c0_0 = arith.constant 0 : index
    %0 = vector.load %arg1[%c0, %c0_0] : memref<8x32xf32, #tpu.memory_space<vmem>>, vector<8x32xf32>
    %c0_1 = arith.constant 0 : index
    %c0_2 = arith.constant 0 : index
    %1 = vector.load %arg3[%c0_1, %c0_2] : memref<32x128xf32, #tpu.memory_space<vmem>>, vector<32x128xf32>
    %cst = arith.constant dense<0.000000e+00> : vector<8x128xf32>
    %2 = tpu.matmul %0, %1, %cst {dimension_numbers = #tpu.dot_dimension_numbers<[1], [0], [0], [1], [0, 0, 1, 1], [], []>} : vector<8x32xf32>, vector<32x128xf32>, vector<8x128xf32> -> vector<8x128xf32>
    %cst_3 = arith.constant 0.0883883461 : f32
    %3 = vector.broadcast %cst_3 : f32 to vector<8x128xf32>
    %4 = arith.mulf %2, %3 : vector<8x128xf32>
    %c0_4 = arith.constant 0 : index
    %c0_5 = arith.constant 0 : index
    %5 = vector.load %arg2[%c0_4, %c0_5] : memref<8x16xf32, #tpu.memory_space<vmem>>, vector<8x16xf32>
    %c0_6 = arith.constant 0 : index
    %c0_7 = arith.constant 0 : index
    %6 = vector.load %arg4[%c0_6, %c0_7] : memref<16x128xf32, #tpu.memory_space<vmem>>, vector<16x128xf32>
    %cst_8 = arith.constant dense<0.000000e+00> : vector<8x128xf32>
    %7 = tpu.matmul %5, %6, %cst_8 {dimension_numbers = #tpu.dot_dimension_numbers<[1], [0], [0], [1], [0, 0, 1, 1], [], []>} : vector<8x16xf32>, vector<16x128xf32>, vector<8x128xf32> -> vector<8x128xf32>
    %8 = arith.mulf %4, %7 : vector<8x128xf32>
    %c0_9 = arith.constant 0 : index
    %c0_10 = arith.constant 0 : index
    %9 = vector.load %arg5[%c0_9, %c0_10] : memref<8x128xf32, #tpu.memory_space<vmem>>, vector<8x128xf32>
    tpu.vector_store %arg5[%c0_9, %c0_10], %8 {strides = array<i32>} : memref<8x128xf32, #tpu.memory_space<vmem>>, vector<8x128xf32>,
    return
  }
  func.func @transform_0(%arg0: i32) -> (i32, i32) {
    %c0_i32 = arith.constant 0 : i32
    %c0_i32_0 = arith.constant 0 : i32
    return %arg0, %c0_i32 : i32, i32
  }
  func.func @transform_1(%arg0: i32) -> (i32, i32) {
    %c0_i32 = arith.constant 0 : i32
    %c0_i32_0 = arith.constant 0 : i32
    return %arg0, %c0_i32 : i32, i32
  }
  func.func @transform_2(%arg0: i32) -> (i32, i32) {
    %c0_i32 = arith.constant 0 : i32
    %c0_i32_0 = arith.constant 0 : i32
    %c0_i32_1 = arith.constant 0 : i32
    return %c0_i32, %c0_i32_0 : i32, i32
  }
  func.func @transform_3(%arg0: i32) -> (i32, i32) {
    %c0_i32 = arith.constant 0 : i32
    %c0_i32_0 = arith.constant 0 : i32
    %c0_i32_1 = arith.constant 0 : i32
    return %c0_i32, %c0_i32_0 : i32, i32
  }
  func.func @transform_4(%arg0: i32) -> (i32, i32) {
    %c0_i32 = arith.constant 0 : i32
    %c0_i32_0 = arith.constant 0 : i32
    return %arg0, %c0_i32 : i32, i32
  }
}

</mosaic_0001>

<bundles_post_ra>
// kernel: tpu_custom_call.1
= control target key start
LH: loop header
LB: loop body
LE: loop exit
PB: predicated region body
PF: predicated region fallthrough
CT: control target
= control target key end

     0   :  { %9 = vsyncpa [#allocation3], 0  ;;  %s439_s0 = inlined_call_operand.hbm [shape: f32[8,32], index: 0, kind: input, shape index: {}]   ;;  %s440_s1 = inlined_call_operand.hbm [shape: f32[8,16], index: 1, kind: input, shape index: {}]   ;;  %s441_s2 = inlined_call_operand.hbm [shape: f32[32,128], index: 2, kind: input, shape index: {}]   ;;  %s442_s3 = inlined_call_operand.hbm [shape: f32[16,128], index: 3, kind: input, shape index: {}]   ;;  %s443_s4 = inlined_call_operand.hbm [shape: f32[8,128], index: 4, kind: output, shape index: {}]  }
   0x1   :  { %10 = vsyncpa [#allocation6], 0 }
   0x2   :  { %11 = vsyncpa [#allocation9], 0 }
   0x3   :  { %12 = vsyncpa [#allocation4], 0  ;;  %s390_s15 = smov [#allocation5]   ;;  %s391_s17 = smov [#allocation2]  }
   0x4   :  { %s29_s16 = sshll.u32 %s390_s15, 4  ;;  %s19_s18 = sshll.u32 %s391_s17, 4  ;;  %s30_s16 = int_to_ptr.vmem [resolvable:$true] %s29_s16  ;;  %s20_s18 = int_to_ptr.vmem [resolvable:$true] %s19_s18 }
   0x5   :  { %s290_s19 = scalar_lea.vmem %s30_s16, 128  ;;  %p295_p1 = scmp.lt.s32.totalorder %s30_s16, %s30_s16 }
   0x6   :  { %p291_p0 = scmp.ne.s32.totalorder %s30_s16, %s290_s19  ;;  %p296_p2 = scmp.lt.s32.totalorder %s290_s19, %s290_s19 }
   0x8   :  { %p297_p3 = por %p296_p2, %p295_p1 }
   0xa   :  { %p298_p4 = pnand %p297_p3, %p291_p0 }
   0xc   :  { %301 = shalt.err (!%p298_p4)
}
   0xd   :  { %32 = dma.hbm_to_vmem [thread:$0]  %s440_s1, 128, %s30_s16, [#allocation6]  }
   0xe   :  { %s310_s22 = scalar_lea.vmem %s20_s18, 128  ;;  %p315_p6 = scmp.lt.s32.totalorder %s20_s18, %s20_s18 }
   0xf   :  { %p311_p5 = scmp.ne.s32.totalorder %s20_s18, %s310_s22  ;;  %p316_p7 = scmp.lt.s32.totalorder %s310_s22, %s310_s22 }
  0x11   :  { %p317_p8 = por %p316_p7, %p315_p6 }
  0x13   :  { %p318_p9 = pnand %p317_p8, %p311_p5 }
  0x15   :  { %321 = shalt.err (!%p318_p9)
}
  0x16   :  { %22 = dma.hbm_to_vmem [thread:$0]  %s439_s0, 128, %s20_s18, [#allocation3]  }
  0x17   :  { %s392_s25 = smov [#allocation7]  }
  0x18   :  { %s38_s26 = sshll.u32 %s392_s25, 4  ;;  %s39_s26 = int_to_ptr.vmem [resolvable:$true] %s38_s26 }
  0x19   :  { %s330_s27 = scalar_lea.vmem %s39_s26, 512  ;;  %p335_p11 = scmp.lt.s32.totalorder %s39_s26, %s39_s26 }
  0x1a   :  { %p331_p10 = scmp.ne.s32.totalorder %s39_s26, %s330_s27  ;;  %p336_p12 = scmp.lt.s32.totalorder %s330_s27, %s330_s27 }
  0x1c   :  { %p337_p13 = por %p336_p12, %p335_p11 }
  0x1e   :  { %p338_p0 = pnand %p337_p13, %p331_p10 }
  0x20   :  { %341 = shalt.err (!%p338_p0)
}
  0x21   :  { %s393_s1 = smov 128   ;;  %s394_s28 = smov 8  }
  0x22   :  { %44 = dma.hbm_to_vmem [thread:$0]  %s441_s2, 512, %s39_s26, [#allocation6], %s393_s1, %s393_s1, %s394_s28  }
  0x23   :  { %s395_s5 = smov [#allocation8]  }
  0x24   :  { %s50_s6 = sshll.u32 %s395_s5, 4  ;;  %s51_s6 = int_to_ptr.vmem [resolvable:$true] %s50_s6 }
  0x25   :  { %s350_s0 = scalar_lea.vmem %s51_s6, 256  ;;  %p355_p2 = scmp.lt.s32.totalorder %s51_s6, %s51_s6 }
  0x26   :  { %p351_p1 = scmp.ne.s32.totalorder %s51_s6, %s350_s0  ;;  %p356_p3 = scmp.lt.s32.totalorder %s350_s0, %s350_s0 }
  0x28   :  { %p357_p4 = por %p356_p3, %p355_p2 }
  0x2a   :  { %p358_p5 = pnand %p357_p4, %p351_p1 }
  0x2c   :  { %361 = shalt.err (!%p358_p5)
}
  0x2d   :  { %56 = dma.hbm_to_vmem [thread:$0]  %s442_s3, 256, %s51_s6, [#allocation9], %s393_s1, %s393_s1, %s394_s28  }
  0x2e   :  { %382 = dma.done.wait [#allocation3], 128  }
  0x2f   :  { %383 = vsyncadd [#allocation3], 4294967168 }
  0x30   :  { %384 = dma.done.wait [#allocation6], 640  }
  0x31   :  { %385 = vsyncadd [#allocation6], 4294966656 }
  0x32   :  { %386 = dma.done.wait [#allocation9], 256  }
  0x33   :  { %387 = vsyncadd [#allocation9], 4294967040  ;;  %v396_v0 = vmov 0.0   ;;  %vm397_vm0 = vmmov 0   ;;  %v73_v1 = vld [vmem:[#allocation7 + $0x18] sm:$0xff]  ;;  %v72_v2 = vld [vmem:[#allocation7 + $0x10] sm:$0xff] }
  0x34   :  { %255 = vmatprep.subr.mxu0 %v396_v0  ;;  %266 = vmatprep.subr.mxu1 %v396_v0  ;;  %v151_v3 = vld [vmem:[#allocation8 + $0x8] sm:$0xff]  ;;  %v150_v4 = vld [vmem:[#allocation8] sm:$0xff]  ;;  %v149_v6 = vld [vmem:[#allocation5] sm:$0xff]  ;;  %vm152_vm1 = vcmask 130048   ;;  %vm74_vm2 = vcmask 261120   ;;  %s398_s2 = smov [#allocation10]  }
  0x35   :  { %263 = vmatprep.mubr.msk.f32.mxu0 %vm397_vm0, %v396_v0  ;;  %270 = vmatprep.mubr.msk.f32.mxu1 %vm397_vm0, %v396_v0  ;;  %v71_v5 = vld [vmem:[#allocation7 + $0x8] sm:$0xff]  ;;  %v70_v7 = vld [vmem:[#allocation7] sm:$0xff]  ;;  %v69_v8 = vld [vmem:[#allocation2] sm:$0xff]  ;;  %s234_s3 = sshll.u32 %s398_s2, 4  ;;  %s235_s3 = int_to_ptr.vmem [resolvable:$true] %s234_s3 }
  0x36   :  { %256 = vmatpush3.msra.mxu0 %v73_v1  ;;  %267 = vmatpush3.msra.mxu1 %v151_v3  ;;  %s362_s9 = scalar_lea.vmem %s235_s3, 128  ;;  %p367_p7 = scmp.lt.s32.totalorder %s235_s3, %s235_s3 }
  0x37   :  { %257 = vmatprep.subr.mxu0 %v396_v0  ;;  %268 = vmatprep.subr.mxu1 %v396_v0  ;;  %p363_p6 = scmp.ne.s32.totalorder %s235_s3, %s362_s9  ;;  %p368_p8 = scmp.lt.s32.totalorder %s362_s9, %s362_s9 }
  0x38   :  { %258 = vmatpush3.msra.mxu0 %v72_v2  ;;  %269 = vmatpush3.msra.mxu1 %v150_v4 }
  0x39   :  { %259 = vmatprep.subr.mxu0 %v396_v0  ;;  %271 = vmatmul.mubr.msk.f32.vlgmr.msra.gmra.mxu1 %vm152_vm1, %v149_v6  ;;  %p369_p9 = por %p368_p8, %p367_p7 }
  0x3a   :  { %260 = vmatpush3.msra.mxu0 %v71_v5 }
  0x3b   :  { %261 = vmatprep.subr.mxu0 %v396_v0  ;;  %p370_p10 = pnand %p369_p9, %p363_p6 }
  0x3c   :  { %262 = vmatpush3.msra.mxu0 %v70_v7 }
  0x3d   :  { %264 = vmatmul.mubr.msk.f32.vlgmr.msra.gmra.mxu0 %vm74_vm2, %v69_v8 }
  0xf9   :  { %v222_v9 = vpop.f32.mrf.mxu1 }
  0xfb   :  { %v272_v10 = vpop.f32.mrf.mxu1 }
  0xfd   :  { %v144_v11 = vpop.f32.mrf.mxu0 }
  0xfe   :  { %v148_v12 = vmul.f32 0.088388346, %v144_v11 }
  0xff   :  { %v265_v13 = vpop.f32.mrf.mxu0 }
 0x100   :  { %v226_v14 = vmul.f32 %v222_v9, %v148_v12 }
 0x102   :  { %227 = vst [vmem:[#allocation10] sm:$0xff] %v226_v14 }
 0x103   :  { %373 = shalt.err (!%p370_p10)
}
 0x104   :  { %237 = dma.vmem_to_hbm [thread:$0]  %s235_s3, 128, %s443_s4, [#allocation4]  }
 0x105   :  { %388 = dma.done.wait [#allocation4], 128  }
 0x106   :  { %389 = vsyncadd [#allocation4], 4294967168 }
 0x107   :  { %241 = vsyncpa [#allocation3], 1 }
 0x108   :  { %242 = vsyncpa [#allocation6], 1 }
 0x109   :  { %243 = vsyncpa [#allocation9], 1 }
 0x10a   :  { %244 = vsyncpa [#allocation4], 1 }

</bundles_post_ra>
